<compile_context>
chip_gen: v5e
topology: v5e:2x2
jax: 0.10.0
libtpu: 0.0.40
codegen_flags: <defaults>
</compile_context>

<pallas_src>
import functools

import jax
import jax.numpy as jnp
from jax.experimental import pallas as pl
from jax.experimental.pallas import tpu as pltpu


def _vmem_capacity_bytes():
    """Best-effort VMEM capacity query; conservative 64 MiB fallback (v7x)."""
    try:
        info = pltpu.get_tpu_info()
        cap = getattr(info, "vmem_capacity_bytes", None)
        if cap:
            return int(cap)
    except Exception:
        pass
    return 64 * 1024 * 1024


def _chip_budgets():
    cap = _vmem_capacity_bytes()
    if cap >= 100 * 1024 * 1024:
        # v5e / v6e: 128 MiB VMEM -> big blocks to amortize per-step overhead.
        return dict(target_block=6 << 20, data_budget=80 << 20,
                    vmem_limit=96 << 20, row_cap=4096)
    # v7x (64 MiB per TensorCore) or unknown: stay conservative.
    return dict(target_block=2 << 20, data_budget=32 << 20,
                vmem_limit=40 << 20, row_cap=2048)


def _choose_block_rows(n, v, itemsize):
    """Row tile sized against the chip's VMEM budget, rounded to the dtype's
    sublane packing, capped so the grid has >= 2 (parallel) steps when the
    problem allows it."""
    cfg = _chip_budgets()
    sub = max(8, 32 // itemsize)               # f32 -> 8, bf16 -> 16, int8 -> 32
    # Per-row VMEM footprint: double-buffered native input + ~3 f32 temps.
    per_row = 2 * v * itemsize + 3 * v * 4 + 64
    tn = min(cfg["target_block"] // max(1, v * itemsize),
             cfg["data_budget"] // max(1, per_row),
             cfg["row_cap"])
    tn = max(sub, (int(tn) // sub) * sub)
    n_rounded = -(-n // sub) * sub
    tn = min(tn, n_rounded)
    # Prefer >= 2 grid steps (v7x dual-TensorCore sharding of the parallel axis).
    if tn >= n_rounded and n_rounded >= 2 * sub:
        half = -(-n_rounded // 2)
        tn = max(sub, (-(-half // sub)) * sub)
    return tn, cfg["vmem_limit"]


def _seq_xent_kernel(logits_ref, side_ref, *out_refs,
                     label_smoothing, per_token, n_rows, block_rows):
    """One row-tile of masked token NLL.

    side_ref holds [target, mask] per row (int32).  Outputs either the
    per-token loss block (per_token=True) or a per-tile partial loss sum.
    """
    i = pl.program_id(0)

    x = logits_ref[...]                                    # (TN, V) native dtype
    xf = x.astype(jnp.float32)                             # f32 math
    tn, v = xf.shape

    tgt = side_ref[:, 0:1]                                 # (TN, 1) int32
    msk = side_ref[:, 1:2]                                 # (TN, 1) int32

    # Ragged tail: rows past n_rows come from an out-of-bounds block read and
    # hold garbage; gate them out of the loss.
    row = i * block_rows + jax.lax.broadcasted_iota(jnp.int32, (tn, 1), 0)
    mask_b = (msk != 0) & (row < n_rows)                   # (TN, 1) bool

    # Negative targets wrap like numpy / jnp.take_along_axis (they are normally
    # masked out anyway; this just pins down the unmasked semantics).
    tgt_eff = jnp.where(tgt < 0, tgt + v, tgt)

    # Pass 1 over the tile: row max + fused target-logit gather
    # (+ sum(logits) when label smoothing is on).  No `shifted` temp.
    m = jnp.max(xf, axis=-1, keepdims=True)                # (TN, 1)
    col = jax.lax.broadcasted_iota(jnp.int32, (tn, v), 1)
    tgt_logit = jnp.sum(jnp.where(col == tgt_eff, xf, 0.0),
                        axis=-1, keepdims=True)            # logits[row, tgt]

    # Pass 2: single exp chain -> logsumexp.
    lse = m + jnp.log(jnp.sum(jnp.exp(xf - m), axis=-1, keepdims=True))
    tgt_logp = tgt_logit - lse                              # (TN, 1)

    if label_smoothing > 0.0:
        sum_logits = jnp.sum(xf, axis=-1, keepdims=True)
        sum_logp = sum_logits - float(v) * lse              # sum(log_probs)
        nll = -((1.0 - label_smoothing) * tgt_logp
                + (label_smoothing / float(v)) * sum_logp)
    else:
        nll = -tgt_logp

    # Use where (not multiply): garbage tail rows may hold inf/NaN which
    # 0 * x would keep.
    loss = jnp.where(mask_b, nll, 0.0)                      # (TN, 1)

    if per_token:
        (loss_ref,) = out_refs
        loss_ref[...] = loss
    else:
        (lsum_ref,) = out_refs                              # (1, 1, 1) block
        lsum_ref[0] = jnp.sum(loss, keepdims=True)


def _run_seq_xent(logits_flat, side_flat, *, label_smoothing, per_token):
    """logits_flat: (N, V) native dtype; side_flat: (N, 2) int32 [target, mask]."""
    n, v = logits_flat.shape
    itemsize = logits_flat.dtype.itemsize
    tn, vmem_limit = _choose_block_rows(n, v, itemsize)
    ntiles = -(-n // tn)

    kernel = functools.partial(
        _seq_xent_kernel,
        label_smoothing=float(label_smoothing),
        per_token=per_token,
        n_rows=n,
        block_rows=tn)

    in_specs = [
        pl.BlockSpec((tn, v), lambda i: (i, 0)),   # logits (native dtype)
        pl.BlockSpec((tn, 2), lambda i: (i, 0)),   # [target, mask]
    ]

    if per_token:
        out_shape = jax.ShapeDtypeStruct((n, 1), jnp.float32)
        out_specs = pl.BlockSpec((tn, 1), lambda i: (i, 0))
        out_bytes = n * 4
    else:
        # Per-tile partial sums (no resident accumulator -> grid stays parallel).
        out_shape = jax.ShapeDtypeStruct((ntiles, 1, 1), jnp.float32)
        out_specs = pl.BlockSpec((1, 1, 1), lambda i: (i, 0, 0))
        out_bytes = ntiles * 4

    cost = pl.CostEstimate(
        flops=6 * n * v,
        transcendentals=n * v,
        bytes_accessed=n * v * itemsize + n * 2 * 4 + out_bytes)

    return pl.pallas_call(
        kernel,
        out_shape=out_shape,
        grid_spec=pltpu.PrefetchScalarGridSpec(
            num_scalar_prefetch=0,
            grid=(ntiles,),
            in_specs=in_specs,
            out_specs=out_specs),
        compiler_params=pltpu.CompilerParams(
            dimension_semantics=("parallel",),
            vmem_limit_bytes=vmem_limit),
        cost_estimate=cost,
    )(logits_flat, side_flat)


class SequenceCrossEntropyLoss:
    """JAX/Pallas port of torchfly SequenceCrossEntropyLoss (forward only)."""

    def __init__(self, label_smoothing=-1, ignore_index=-1, reduce=None):
        if reduce not in [None, "none", "mean", "batch", "batch-sequence"]:
            raise NotImplementedError
        self.reduce = reduce
        self.label_smoothing = label_smoothing
        self.ignore_index = ignore_index

    def __call__(self, logits, targets, mask=None):
        # logits: (B, S, V); targets: (B, S) int; mask: optional (B, S) bool
        b, s, v = logits.shape
        logits_flat = logits.reshape(-1, v)                # native dtype on the wire

        targets_i = targets.astype(jnp.int32)
        if mask is None:
            mask_i = (targets_i != self.ignore_index).astype(jnp.int32)
        else:
            mask_i = mask.astype(jnp.int32)
        side = jnp.stack([targets_i.reshape(-1), mask_i.reshape(-1)], axis=-1)  # (N, 2)

        if self.reduce == "mean":
            # Sums-only fast path; the token count only needs the mask, so it is
            # computed in plain JAX (O(N) int reduction, negligible vs N*V read).
            lsum = _run_seq_xent(logits_flat, side,
                                 label_smoothing=self.label_smoothing,
                                 per_token=False)
            denom = mask_i.astype(jnp.float32).sum()
            return lsum.sum() / (denom + 1e-13)

        loss_flat = _run_seq_xent(logits_flat, side,
                                  label_smoothing=self.label_smoothing,
                                  per_token=True)
        loss = loss_flat.reshape(b, s)                     # masked per-token NLL

        if self.reduce in ("batch", "batch-sequence"):
            mask_f = mask_i.astype(jnp.float32)
            if self.reduce == "batch":
                return loss.sum(axis=1) / (mask_f.sum(axis=1) + 1e-13)
            return loss.sum(axis=1)
        return loss                                        # reduce in (None, "none")


def _reference(logits, targets, mask, label_smoothing, reduce):
    """Pure-JAX reference mirroring the PyTorch function (for sanity checking)."""
    v = logits.shape[-1]
    logits_flat = logits.reshape(-1, v).astype(jnp.float32)
    log_probs = jax.nn.log_softmax(logits_flat, axis=-1)
    targets_flat = targets.reshape(-1)
    if label_smoothing > 0.0:
        smoothing_value = label_smoothing / float(v)
        one_hot = jax.nn.one_hot(targets_flat, v) * (1.0 - label_smoothing)
        smoothed = one_hot + smoothing_value
        nll = -(log_probs * smoothed).sum(-1)
    else:
        nll = -jnp.take_along_axis(log_probs, targets_flat[:, None], axis=1)[:, 0]
    nll = nll.reshape(logits.shape[0], logits.shape[1])
    mask_f = mask.astype(jnp.float32)
    loss = nll * mask_f
    if reduce == "mean":
        return loss.sum() / (mask_f.sum() + 1e-13)
    if reduce == "batch":
        return loss.sum(1) / (mask_f.sum(1) + 1e-13)
    if reduce == "batch-sequence":
        return loss.sum(1)
    return loss


if __name__ == "__main__":
    key = jax.random.PRNGKey(0)
    B, S, V = 2, 8, 128
    k1, k2, k3, k4 = jax.random.split(key, 4)

    logits = jax.random.normal(k1, (B, S, V), dtype=jnp.float32)
    targets_valid = jax.random.randint(k2, (B, S), 0, V, dtype=jnp.int32)
    drop = jax.random.bernoulli(k3, 0.25, (B, S))
    targets = jnp.where(drop, -1, targets_valid)       # sprinkle ignore_index tokens
    mask_auto = targets != -1

    # 1) per-token loss (reduce=None), mask derived from ignore_index
    out = jax.block_until_ready(SequenceCrossEntropyLoss()(logits, targets))
    ref = _reference(logits, targets, mask_auto, -1, None)
    assert jnp.allclose(out, ref, atol=1e-5, rtol=1e-5), "per-token mismatch"

    # 2) reduce='mean' fast path (sums-only kernel, no per-token output)
    out = jax.block_until_ready(
        SequenceCrossEntropyLoss(reduce="mean")(logits, targets))
    ref = _reference(logits, targets, mask_auto, -1, "mean")
    assert jnp.allclose(out, ref, atol=1e-5, rtol=1e-5), "mean mismatch"

    # 3) label smoothing
    out = jax.block_until_ready(
        SequenceCrossEntropyLoss(label_smoothing=0.1, reduce="mean")(logits, targets))
    ref = _reference(logits, targets, mask_auto, 0.1, "mean")
    assert jnp.allclose(out, ref, atol=1e-5, rtol=1e-5), "label-smoothing mismatch"

    # 4) explicit mask with in-range targets (the spec's gather is undefined for
    #    out-of-range targets), reduce='batch' and 'batch-sequence'
    mask_explicit = jax.random.bernoulli(k4, 0.8, (B, S))
    out_b = jax.block_until_ready(
        SequenceCrossEntropyLoss(reduce="batch")(logits, targets_valid, mask_explicit))
    ref_b = _reference(logits, targets_valid, mask_explicit, -1, "batch")
    assert jnp.allclose(out_b, ref_b, atol=1e-5, rtol=1e-5), "batch mismatch"
    out_bs = jax.block_until_ready(
        SequenceCrossEntropyLoss(reduce="batch-sequence")(logits, targets_valid,
                                                          mask_explicit))
    ref_bs = _reference(logits, targets_valid, mask_explicit, -1, "batch-sequence")
    assert jnp.allclose(out_bs, ref_bs, atol=1e-5, rtol=1e-5), "batch-seq mismatch"

    # 5) ragged row count + vocab not a multiple of 128 (exercises tail masking)
    B2, S2, V2 = 2, 7, 160
    logits2 = jax.random.normal(k1, (B2, S2, V2), dtype=jnp.float32)
    targets2 = jax.random.randint(k2, (B2, S2), 0, V2, dtype=jnp.int32)
    targets2 = jnp.where(jax.random.bernoulli(k3, 0.3, (B2, S2)), -1, targets2)
    out2 = jax.block_until_ready(
        SequenceCrossEntropyLoss(reduce="mean")(logits2, targets2))
    ref2 = _reference(logits2, targets2, targets2 != -1, -1, "mean")
    assert jnp.allclose(out2, ref2, atol=1e-5, rtol=1e-5), "ragged mean mismatch"
    out2t = jax.block_until_ready(SequenceCrossEntropyLoss()(logits2, targets2))
    ref2t = _reference(logits2, targets2, targets2 != -1, -1, None)
    assert jnp.allclose(out2t, ref2t, atol=1e-5, rtol=1e-5), "ragged per-token mismatch"

    # 6) bf16 logits stay bf16 on the HBM->VMEM wire (f32 math in-kernel)
    logits_bf16 = logits.astype(jnp.bfloat16)
    out_bf = jax.block_until_ready(
        SequenceCrossEntropyLoss(reduce="mean")(logits_bf16, targets))
    ref_bf = _reference(logits_bf16.astype(jnp.float32), targets, mask_auto, -1, "mean")
    assert jnp.allclose(out_bf, ref_bf, atol=1e-3, rtol=1e-3), "bf16 mismatch"

    print("KERNEL_OK")
</pallas_src>

<mosaic_0001>
module attributes {stable_mosaic.version = 11 : i64} {
  func.func @_seq_xent_kernel(%arg0: i32, %arg1: memref<8x128xf32, #tpu.memory_space<vmem>>, %arg2: memref<8x2xi32, #tpu.memory_space<vmem>>, %arg3: memref<8x1xf32, #tpu.memory_space<vmem>>) attributes {dimension_semantics = [#tpu.dimension_semantics<parallel>], iteration_bounds = array<i64: 2>, scalar_prefetch = 0 : i64, scratch_operands = 0 : i64, tpu.core_type = #tpu.core_type<tc>, window_params = [{transform_indices = @transform_0, window_bounds = array<i64: 8, 128>}, {transform_indices = @transform_1, window_bounds = array<i64: 8, 2>}, {transform_indices = @transform_2, window_bounds = array<i64: 8, 1>}]} {
    %c0 = arith.constant 0 : index
    %c0_0 = arith.constant 0 : index
    %0 = vector.load %arg1[%c0, %c0_0] : memref<8x128xf32, #tpu.memory_space<vmem>>, vector<8x128xf32>
    %c0_1 = arith.constant 0 : index
    %c0_2 = arith.constant 0 : index
    %1 = vector.load %arg2[%c0_1, %c0_2] : memref<8x2xi32, #tpu.memory_space<vmem>>, vector<8x1xi32>
    %c0_3 = arith.constant 0 : index
    %c1 = arith.constant 1 : index
    %2 = vector.load %arg2[%c0_3, %c1] : memref<8x2xi32, #tpu.memory_space<vmem>>, vector<8x1xi32>
    %c8_i32 = arith.constant 8 : i32
    %3 = arith.muli %arg0, %c8_i32 : i32
    %4 = tpu.iota {dimensions = array<i32: 0>} : vector<8x1xi32>
    %5 = vector.broadcast %3 : i32 to vector<8x1xi32>
    %6 = arith.addi %5, %4 : vector<8x1xi32>
    %c0_i32 = arith.constant 0 : i32
    %7 = vector.broadcast %c0_i32 : i32 to vector<8x1xi32>
    %8 = arith.cmpi ne, %2, %7 : vector<8x1xi32>
    %c16_i32 = arith.constant 16 : i32
    %9 = vector.broadcast %c16_i32 : i32 to vector<8x1xi32>
    %10 = arith.cmpi slt, %6, %9 : vector<8x1xi32>
    %11 = arith.andi %8, %10 : vector<8x1xi1>
    %c0_i32_4 = arith.constant 0 : i32
    %12 = vector.broadcast %c0_i32_4 : i32 to vector<8x1xi32>
    %13 = arith.cmpi slt, %1, %12 : vector<8x1xi32>
    %c128_i32 = arith.constant 128 : i32
    %14 = vector.broadcast %c128_i32 : i32 to vector<8x1xi32>
    %15 = arith.addi %1, %14 : vector<8x1xi32>
    %16 = arith.select %13, %15, %1 : vector<8x1xi1>, vector<8x1xi32>
    %cst = arith.constant dense<0xFF800000> : vector<8xf32>
    %17 = vector.multi_reduction <maximumf>, %0, %cst [1] : vector<8x128xf32> to vector<8xf32>
    %18 = vector.shape_cast %17 : vector<8xf32> to vector<8x1xf32>
    %19 = tpu.iota {dimensions = array<i32: 1>} : vector<8x128xi32>
    %20 = vector.broadcast %16 : vector<8x1xi32> to vector<8x128xi32>
    %21 = arith.cmpi eq, %19, %20 : vector<8x128xi32>
    %cst_5 = arith.constant 0.000000e+00 : f32
    %22 = vector.broadcast %cst_5 : f32 to vector<8x128xf32>
    %23 = arith.select %21, %0, %22 : vector<8x128xi1>, vector<8x128xf32>
    %cst_6 = arith.constant dense<0.000000e+00> : vector<8xf32>
    %24 = vector.multi_reduction <add>, %23, %cst_6 [1] : vector<8x128xf32> to vector<8xf32>
    %25 = vector.shape_cast %24 : vector<8xf32> to vector<8x1xf32>
    %26 = vector.broadcast %18 : vector<8x1xf32> to vector<8x128xf32>
    %27 = arith.subf %0, %26 : vector<8x128xf32>
    %28 = math.exp %27 : vector<8x128xf32>
    %cst_7 = arith.constant dense<0.000000e+00> : vector<8xf32>
    %29 = vector.multi_reduction <add>, %28, %cst_7 [1] : vector<8x128xf32> to vector<8xf32>
    %30 = vector.shape_cast %29 : vector<8xf32> to vector<8x1xf32>
    %31 = math.log %30 : vector<8x1xf32>
    %32 = arith.addf %18, %31 : vector<8x1xf32>
    %33 = arith.subf %25, %32 : vector<8x1xf32>
    %cst_8 = arith.constant 0.000000e+00 : f32
    %34 = vector.broadcast %cst_8 : f32 to vector<8x1xf32>
    %35 = arith.subf %34, %33 : vector<8x1xf32>
    %cst_9 = arith.constant 0.000000e+00 : f32
    %36 = vector.broadcast %cst_9 : f32 to vector<8x1xf32>
    %37 = arith.select %11, %35, %36 : vector<8x1xi1>, vector<8x1xf32>
    %c0_10 = arith.constant 0 : index
    %c0_11 = arith.constant 0 : index
    %38 = vector.load %arg3[%c0_10, %c0_11] : memref<8x1xf32, #tpu.memory_space<vmem>>, vector<8x1xf32>
    tpu.vector_store %arg3[%c0_10, %c0_11], %37 {strides = array<i32>} : memref<8x1xf32, #tpu.memory_space<vmem>>, vector<8x1xf32>,
    return
  }
  func.func @transform_0(%arg0: i32) -> (i32, i32) {
    %c0_i32 = arith.constant 0 : i32
    %c0_i32_0 = arith.constant 0 : i32
    return %arg0, %c0_i32 : i32, i32
  }
  func.func @transform_1(%arg0: i32) -> (i32, i32) {
    %c0_i32 = arith.constant 0 : i32
    %c0_i32_0 = arith.constant 0 : i32
    return %arg0, %c0_i32 : i32, i32
  }
  func.func @transform_2(%arg0: i32) -> (i32, i32) {
    %c0_i32 = arith.constant 0 : i32
    %c0_i32_0 = arith.constant 0 : i32
    return %arg0, %c0_i32 : i32, i32
  }
}

</mosaic_0001>

<bundles_post_ra>
// kernel: tpu_custom_call.1
= control target key start
LH: loop header
LB: loop body
LE: loop exit
PB: predicated region body
PF: predicated region fallthrough
CT: control target
= control target key end

     0   :  { %s313_s9 = smov 0   ;;  %s343_s0 = inlined_call_operand.vmem [shape: f32[16,128], index: 0, kind: input, shape index: {}]   ;;  %s344_s1 = inlined_call_operand.vmem [shape: s32[16,2], index: 1, kind: input, shape index: {}]   ;;  %s345_s2 = inlined_call_operand.vmem [shape: f32[16,1], index: 2, kind: output, shape index: {}]  }
   0x1 LB: > { %s319_s10 = sadd.s32 4294967295, %s294_s9   ;;  %p266_p0 = scmp.ge.s32.totalorder %s294_s9, 1  ;;  %s294_s9 = sphi %s313_s9, %s12_s9  }
   0x2   : > { %p120_p1 = scmp.lt.s32.totalorder %s294_s9, 3 }
   0x4   : > { %p121_p2 = pnand %p266_p0, %p120_p1 }
   0x5   : > { %p144_p3 = scmp.lt.s32.totalorder (!%p121_p2), %s319_s10, 1  ;;  %s270_s19 = sshll.u32 (!%p121_p2), %s319_s10, 3 }
   0x6   : > { %124 = sbr.rel (%p121_p2) target bundleno = 367 (0x16f), region = 28  ;;  %s297_s20 = smov (!%p121_p2), 127  }
   0xb   : > { %v296_v0 = vmov 0   ;;  %s145_s11 = scalar_select %p144_p3, %s319_s10, 1  ;;  %v159_v9 = vlaneseq  ;;  %v161_v15 = vstv %s270_s19  ;;  %vm195_vm5 = vcmask 7168  }
   0xc   : > { %283 = vset.pattern.permute.xlu0 %v296_v0 }
   0xd   : > { %s325_s12 = sshll.u32 %s145_s11, 3  ;;  %v172_v10 = vand.u32 127, %v159_v9  ;;  %v160_v14 = vshrl.u32 %v159_v9, 7 }
   0xe   : > { %s147_s15 = scalar_lea.vmem %s343_s0, %s325_s12  ;;  %s151_s18 = scalar_lea.vmem %s344_s1, %s325_s12 }
   0xf   : > { %v156_v1 = vld [vmem:[%s147_s15] sm:$0xff]  ;;  %v162_v16 = vadd.s32 %v161_v15, %v160_v14  ;;  %s155_s23 = scalar_lea.vmem %s345_s2, %s325_s12 }
  0x10   : > { %169 = vmax.xlane.f32.xlu0 %v156_v1  ;;  %v157_v2 = vld [vmem:[%s151_s18] sm:$0xff] }
  0x11   : > { %v167_v3 = vadd.s32 128, %v157_v2  ;;  %vm166_vm0 = vcmp.lt.s32.totalorder %v157_v2, 0  ;;  %vm163_vm2 = vcmp.ne.s32.totalorder %v157_v2, 0  ;;  %vm164_vm3 = vcmp.lt.s32.totalorder %v162_v16, 16 }
  0x12   : > { %vm165_vm4 = vmand %vm163_vm2, %vm164_vm3 }
  0x13   : > { %v168_v4 = vsel %vm166_vm0, %v167_v3, %v157_v2 }
  0x24   : > { %174 = vperm.xlu0 %283, %v168_v4  }
  0x83   : > { %v170_v5 = vpop.xlane.xlu0 %169 }
  0x84   : > { %v180_v6 = vsub.f32 %v156_v1, %v170_v5 }
  0x86   : > { %v181_v7 = vmul.f32 1.442695, %v180_v6 }
  0x88   : > { %284 = vpow2.f32 %v181_v7 }
  0x8e   : > { %v285_v8 = vpop.eup %284 }
  0x8f   : > { %183 = vadd.xlane.f32.xlu1 %v285_v8 }
  0x96   : > { %v175_v11 = vpop.permute.xlu0 %174 }
  0x97   : > { %vm176_vm1 = vcmp.eq.s32.totalorder %v172_v10, %v175_v11 }
  0x98   : > { %v177_v12 = vsel %vm176_vm1, %v156_v1, 0.0 }
  0x99   : > { %178 = vadd.xlane.f32.xlu1 %v177_v12 }
 0x102   : > { %v184_v13 = vpop.xlane.xlu1 %183 }
 0x103   : > { %286 = vlog2.f32 %v184_v13 }
 0x109   : > { %v287_v17 = vpop.eup %286 }
 0x10a   : > { %v186_v18 = vmul.f32 0.6931472, %v287_v17 }
 0x10c   : > { %v187_v19 = vadd.f32 %v186_v18, %v170_v5  ;;  %v179_v20 = vpop.xlane.xlu1 %178 }
 0x10e   : > { %v188_v21 = vsub.f32 %v179_v20, %v187_v19 }
 0x110   : > { %v189_v22 = vsub.f32 0.0, %v188_v21 }
 0x112   : > { %v190_v23 = vsel %vm165_vm4, %v189_v22, 0.0 }
 0x113   : > { %192 = vrot.lane.b32.xlu2 %v190_v23, %s297_s20 }
 0x16d   : > { %v193_v24 = vpop.permute.xlu2 %192 }
 0x16e   : > { %196 = vst.msk [vmem:[%s155_s23] sm:$0xff] %vm195_vm5, %v193_v24 }
 0x16f PF: > { %s12_s9 = sadd.s32 1, %s294_s9  }
 0x170   : > { %p9_p4 = scmp.ge.s32.totalorder %s12_s9, 4  }
 0x172   :  { %11 = sbr.rel (!%p9_p4) target bundleno = 1 (0x1), region = 61 }

</bundles_post_ra>
